<compile_context>
chip_gen: v6e
topology: v6e:2x2x1
jax: 0.10.0
libtpu: 0.0.40
codegen_flags: <defaults>
</compile_context>

<pallas_src>
import jax
import jax.numpy as jnp
from jax.experimental import pallas as pl
from jax.experimental.pallas import tpu as pltpu


def repconv_kernel(x_ref, w_ref, b_ref, o_ref):
    # x_ref: (bn, Cin, tl)  w_ref: (Cout, Cin)  b_ref: (Cout, 1)  o_ref: (bn, Cout, tl)
    w = w_ref[...]
    b = b_ref[...]
    # bn is a small static constant -> unrolled; each iter is a plain lane-dense
    # (Cout,Cin)@(Cin,tl) MXU matmul with a lane-dense store, no transposes.
    for i in range(x_ref.shape[0]):
        y = jnp.dot(w, x_ref[i], preferred_element_type=jnp.float32)   # (Cout, tl)
        o_ref[i] = (y + b).astype(o_ref.dtype)


def _fold_params(w1, bn1, w2, bn2, eps=1e-5):
    """Fold conv1(k=1) -> BN1 -> conv2(k=1) -> BN2 into y = W_eff @ x + b_eff."""
    s1 = bn1["gamma"] / jnp.sqrt(bn1["var"] + eps)          # (Chid,)
    b1 = bn1["beta"] - bn1["mean"] * s1                     # (Chid,)
    s2 = bn2["gamma"] / jnp.sqrt(bn2["var"] + eps)          # (Cout,)
    b2 = bn2["beta"] - bn2["mean"] * s2                     # (Cout,)
    w1m = w1[:, :, 0]                                       # (Chid, Cin)
    w2m = w2[:, :, 0]                                       # (Cout, Chid)
    w2s = w2m * s2[:, None]                                 # diag(s2) @ W2
    w_eff = w2s @ (w1m * s1[:, None])                       # (Cout, Cin)
    b_eff = w2s @ b1 + b2                                   # (Cout,)
    return w_eff, b_eff


def repconv_pallas(x_ncl, w1, bn1, w2, bn2, *, max_tl=1024, max_bn=8,
                   vmem_budget_bytes=8 << 20):
    """x_ncl: (N, Cin, L).  w1: (Chid, Cin, 1), w2: (Cout, Chid, 1).
    bn1/bn2: dicts with gamma, beta, mean, var (per-channel, eval-mode BN)."""
    N, Cin, L = x_ncl.shape
    Cout = w2.shape[0]

    w_eff, b_eff = _fold_params(w1, bn1, w2, bn2)
    w_eff = w_eff.astype(jnp.float32)                       # (Cout, Cin)
    b_col = b_eff.astype(jnp.float32).reshape(Cout, 1)      # (Cout, 1)

    itemsize = jnp.dtype(x_ncl.dtype).itemsize
    # bytes of one double-buffered (x + out) block pair, per lane column per batch row
    col_bytes = (Cin + Cout) * itemsize * 2

    # Lane tile along L: whole axis if it fits, else the largest multiple of 128
    # within the VMEM budget (capped at max_tl).  No host pad / slice: the
    # boundary block is masked by Pallas.
    if L <= max_tl:
        tl = L
    else:
        cand = (vmem_budget_bytes // col_bytes) // 128 * 128
        tl = min(max_tl, max(128, cand))
    grid_l = pl.cdiv(L, tl)

    # Batch block: grow per-step work when channels / L are small.
    per_batch_bytes = col_bytes * tl
    bn = max(1, min(N, max_bn, vmem_budget_bytes // per_batch_bytes))
    if grid_l == 1 and bn == N and N > 1:
        bn = (N + 1) // 2      # keep >= 2 parallel grid steps for v7x megacore
    grid_n = pl.cdiv(N, bn)
    grid = (grid_n, grid_l)

    # Explicit scoped-VMEM sizing (double-buffered x/out blocks + weights + headroom),
    # capped at 48 MiB so it is always below v7x's 64 MiB physical VMEM.
    block_bytes = 2 * bn * (Cin + Cout) * tl * itemsize
    weight_bytes = 2 * (Cout * Cin + Cout) * 4
    vmem_limit = int(min(max(2 * (block_bytes + weight_bytes) + (2 << 20), 16 << 20),
                         48 << 20))

    cost = pl.CostEstimate(
        flops=2 * N * L * Cin * Cout,
        transcendentals=0,
        bytes_accessed=itemsize * N * L * (Cin + Cout) + 4 * (Cout * Cin + Cout),
    )

    out = pl.pallas_call(
        repconv_kernel,
        out_shape=jax.ShapeDtypeStruct((N, Cout, L), x_ncl.dtype),
        grid_spec=pltpu.PrefetchScalarGridSpec(
            num_scalar_prefetch=0,
            grid=grid,
            in_specs=[
                pl.BlockSpec((bn, Cin, tl), lambda n, j: (n, 0, j)),
                pl.BlockSpec((Cout, Cin), lambda n, j: (0, 0)),
                pl.BlockSpec((Cout, 1), lambda n, j: (0, 0)),
            ],
            out_specs=pl.BlockSpec((bn, Cout, tl), lambda n, j: (n, 0, j)),
        ),
        compiler_params=pltpu.CompilerParams(
            dimension_semantics=("parallel", "parallel"),
            vmem_limit_bytes=vmem_limit,
        ),
        cost_estimate=cost,
    )(x_ncl, w_eff, b_col)
    return out


def repconv_ref(x_ncl, w1, bn1, w2, bn2):
    """Pure-JAX reference (unfolded two-stage conv+BN, eval-mode), mirrors PyTorch."""
    eps = 1e-5

    def conv1x1(x, w):  # x: (N,C,L), w: (O,C,1)
        return jnp.einsum("ncl,oc->nol", x, w[:, :, 0])

    def bn(x, p):
        s = p["gamma"] / jnp.sqrt(p["var"] + eps)
        b = p["beta"] - p["mean"] * s
        return x * s[None, :, None] + b[None, :, None]

    return bn(conv1x1(bn(conv1x1(x_ncl, w1), bn1), w2), bn2)


if __name__ == "__main__":
    key = jax.random.PRNGKey(0)
    N, Cin, L = 2, 4, 16
    Chid = int(Cin * 1.5)          # = 6, matches the PyTorch module
    Cout = 8

    ks = jax.random.split(key, 12)
    x = jax.random.normal(ks[0], (N, Cin, L), dtype=jnp.float32)

    w1 = jax.random.normal(ks[1], (Chid, Cin, 1), dtype=jnp.float32) * 0.5
    w2 = jax.random.normal(ks[2], (Cout, Chid, 1), dtype=jnp.float32) * 0.5

    bn1 = dict(
        gamma=jax.random.normal(ks[3], (Chid,), dtype=jnp.float32) * 0.1 + 1.0,
        beta=jax.random.normal(ks[4], (Chid,), dtype=jnp.float32) * 0.1,
        mean=jax.random.normal(ks[5], (Chid,), dtype=jnp.float32) * 0.1,
        var=jnp.abs(jax.random.normal(ks[6], (Chid,), dtype=jnp.float32)) * 0.1 + 1.0,
    )
    bn2 = dict(
        gamma=jax.random.normal(ks[7], (Cout,), dtype=jnp.float32) * 0.1 + 1.0,
        beta=jax.random.normal(ks[8], (Cout,), dtype=jnp.float32) * 0.1,
        mean=jax.random.normal(ks[9], (Cout,), dtype=jnp.float32) * 0.1,
        var=jnp.abs(jax.random.normal(ks[10], (Cout,), dtype=jnp.float32)) * 0.1 + 1.0,
    )

    out = repconv_pallas(x, w1, bn1, w2, bn2)
    out = jax.block_until_ready(out)

    ref = repconv_ref(x, w1, bn1, w2, bn2)
    assert out.shape == (N, Cout, L), out.shape
    assert jnp.allclose(out, ref, atol=1e-4, rtol=1e-4), "mismatch vs reference"

    print("KERNEL_OK")
</pallas_src>

<mosaic_0001>
module attributes {stable_mosaic.version = 11 : i64} {
  func.func @repconv_kernel(%arg0: i32, %arg1: i32, %arg2: memref<1x4x16xf32, #tpu.memory_space<vmem>>, %arg3: memref<8x4xf32, #tpu.memory_space<vmem>>, %arg4: memref<8x1xf32, #tpu.memory_space<vmem>>, %arg5: memref<1x8x16xf32, #tpu.memory_space<vmem>>) attributes {dimension_semantics = [#tpu.dimension_semantics<parallel>, #tpu.dimension_semantics<parallel>], iteration_bounds = array<i64: 2, 1>, scalar_prefetch = 0 : i64, scratch_operands = 0 : i64, tpu.core_type = #tpu.core_type<tc>, window_params = [{transform_indices = @transform_0, window_bounds = array<i64: 1, 4, 16>}, {pipeline_mode = #tpu.pipeline_mode<synchronous>, transform_indices = @transform_1, window_bounds = array<i64: 8, 4>}, {pipeline_mode = #tpu.pipeline_mode<synchronous>, transform_indices = @transform_2, window_bounds = array<i64: 8, 1>}, {transform_indices = @transform_3, window_bounds = array<i64: 1, 8, 16>}]} {
    %c0 = arith.constant 0 : index
    %c0_0 = arith.constant 0 : index
    %0 = vector.load %arg3[%c0, %c0_0] : memref<8x4xf32, #tpu.memory_space<vmem>>, vector<8x4xf32>
    %c0_1 = arith.constant 0 : index
    %c0_2 = arith.constant 0 : index
    %1 = vector.load %arg4[%c0_1, %c0_2] : memref<8x1xf32, #tpu.memory_space<vmem>>, vector<8x1xf32>
    %c0_3 = arith.constant 0 : index
    %c0_4 = arith.constant 0 : index
    %c0_5 = arith.constant 0 : index
    %2 = vector.load %arg2[%c0_3, %c0_4, %c0_5] : memref<1x4x16xf32, #tpu.memory_space<vmem>>, vector<1x4x16xf32>
    %3 = vector.shape_cast %2 : vector<1x4x16xf32> to vector<4x16xf32>
    %cst = arith.constant dense<0.000000e+00> : vector<8x16xf32>
    %4 = tpu.matmul %0, %3, %cst {dimension_numbers = #tpu.dot_dimension_numbers<[1], [0], [0], [1], [0, 0, 1, 1], [], []>} : vector<8x4xf32>, vector<4x16xf32>, vector<8x16xf32> -> vector<8x16xf32>
    %5 = vector.broadcast %1 : vector<8x1xf32> to vector<8x16xf32>
    %6 = arith.addf %4, %5 : vector<8x16xf32>
    %c0_6 = arith.constant 0 : index
    %c0_7 = arith.constant 0 : index
    %c0_8 = arith.constant 0 : index
    %7 = vector.load %arg5[%c0_6, %c0_7, %c0_8] : memref<1x8x16xf32, #tpu.memory_space<vmem>>, vector<1x8x16xf32>
    %8 = vector.shape_cast %7 : vector<1x8x16xf32> to vector<8x16xf32>
    %9 = vector.shape_cast %6 : vector<8x16xf32> to vector<1x8x16xf32>
    tpu.vector_store %arg5[%c0_6, %c0_7, %c0_8], %9 {strides = array<i32>} : memref<1x8x16xf32, #tpu.memory_space<vmem>>, vector<1x8x16xf32>,
    return
  }
  func.func @transform_0(%arg0: i32, %arg1: i32) -> (i32, i32, i32) {
    %c0_i32 = arith.constant 0 : i32
    %c0_i32_0 = arith.constant 0 : i32
    return %arg0, %c0_i32, %arg1 : i32, i32, i32
  }
  func.func @transform_1(%arg0: i32, %arg1: i32) -> (i32, i32) {
    %c0_i32 = arith.constant 0 : i32
    %c0_i32_0 = arith.constant 0 : i32
    %c0_i32_1 = arith.constant 0 : i32
    return %c0_i32, %c0_i32_0 : i32, i32
  }
  func.func @transform_2(%arg0: i32, %arg1: i32) -> (i32, i32) {
    %c0_i32 = arith.constant 0 : i32
    %c0_i32_0 = arith.constant 0 : i32
    %c0_i32_1 = arith.constant 0 : i32
    return %c0_i32, %c0_i32_0 : i32, i32
  }
  func.func @transform_3(%arg0: i32, %arg1: i32) -> (i32, i32, i32) {
    %c0_i32 = arith.constant 0 : i32
    %c0_i32_0 = arith.constant 0 : i32
    return %arg0, %c0_i32, %arg1 : i32, i32, i32
  }
}

</mosaic_0001>

<bundles_post_ra>
// kernel: tpu_custom_call.1
= control target key start
LH: loop header
LB: loop body
LE: loop exit
PB: predicated region body
PF: predicated region fallthrough
CT: control target
= control target key end

     0   :  { %8 = vsyncpa [#allocation3], 0  ;;  %s657_s0 = inlined_call_operand.vmem [shape: f32[2,4,16], index: 0, kind: input, shape index: {}]   ;;  %s658_s1 = inlined_call_operand.vmem [shape: f32[8,4], index: 1, kind: input, shape index: {}]   ;;  %s659_s2 = inlined_call_operand.vmem [shape: f32[8,1], index: 2, kind: input, shape index: {}]   ;;  %s660_s3 = inlined_call_operand.hbm [shape: f32[2,8,16], index: 3, kind: output, shape index: {}]  }
   0x1   :  { %10 = vsyncpa [#allocation3 + $0x1], 0  ;;  %s546_s12 = smov 0   ;;  %s548_s13 = smov 0  }
   0x2   :  { %s550_s14 = smov 0   ;;  %s552_s15 = smov 0  }
   0x3   :  { %s554_s16 = smov 0   ;;  %s556_s17 = smov 0  }
   0x4 LB: > { %s365_s18 = sadd.s32 4294967295, %s520_s17   ;;  %s366_s19 = sadd.s32 4294967294, %s520_s17   ;;  %s520_s17 = sphi %s556_s17, %s16_s17   ;;  %s516_s16 = sphi %s554_s16, %s667_s16   ;;  %s512_s15 = sphi %s552_s15, %s666_s15   ;;  %s508_s14 = sphi %s550_s14, %s665_s14   ;;  %s504_s13 = sphi %s548_s13, %s664_s13   ;;  %s500_s12 = sphi %s546_s12, %s663_s12  }
   0x5   : > { %s28_s20 = sadd.s32 1, %s516_s16  ;;  %s107_s21 = sadd.s32 1, %s508_s14 }
   0x6   : > { %p30_p0 = scmp.ge.s32.totalorder %s28_s20, 2  ;;  %p117_p1 = scmp.ne.s32.totalorder %s508_s14, %s504_s13 }
   0x7   : > { %p118_p2 = scmp.eq.s32.totalorder %s365_s18, 1  ;;  %p123_p3 = scmp.ne.s32.totalorder %s504_s13, %s500_s12 }
   0x8   : > { %s669_s20 = smov (%p30_p0, %s28_s20), 0  ;;  %p124_p5 = scmp.eq.s32.totalorder %s366_s19, 1 }
   0x9   : > { %p586_p4 = por %p118_p2, %p117_p1  ;;  %s102_s23 = ssub.s32 %s516_s16, %s669_s20 }
   0xa   : > { %p369_p6 = scmp.ge.s32.totalorder %s520_s17, 1  ;;  %p105_p7 = scmp.eq.s32.totalorder %s102_s23, 0 }
   0xb   : > { %p593_p8 = por %p124_p5, %p123_p3  ;;  %p158_p9 = scmp.lt.s32.totalorder %s520_s17, 3 }
   0xc   : > { %s599_s25 = scalar_select %p105_p7, %s508_s14, %s107_s21  }
   0xd   : > { %p159_p10 = pnand %p369_p6, %p158_p9 }
   0xe   : > { %p184_p11 = scmp.lt.s32.totalorder (!%p159_p10), %s512_s15, 1  ;;  %s181_s8 = sand.u32 (!%p159_p10), 1, %s504_s13  }
   0xf   : > { %162 = sbr.rel (%p159_p10) target bundleno = 234 (0xea), region = 32  ;;  %s370_s9 = sshll.u32 (!%p159_p10), %s181_s8, 3 }
  0x10   : > { %s375_s10 = sshll.u32 (!%p159_p10), %s512_s15, 7  ;;  %s183_s11 = scalar_lea.vmem (!%p159_p10), [#allocation2], %s370_s9 }
  0x11   : > { %s294_s18 = sshll.u32 (!%p159_p10), %s183_s11, 4  ;;  %s617_s23 = scalar_lea.hbm (!%p159_p10), %s660_s3, %s375_s10  ;;  %s295_s18 = int_to_ptr.vmem [resolvable:$true] %s294_s18 }
  0x12   : > { %s280_s26 = scalar_lea.sflag (!%p159_p10), [#allocation3], %s181_s8  ;;  %s444_s27 = scalar_lea.vmem (!%p159_p10), %s295_s18, 128 }
  0x13   : > { %p445_p12 = scmp.ne.s32.totalorder (!%p159_p10), %s295_s18, %s444_s27 }
  0x14   : > { %v522_v0 = vmov 0.0   ;;  %vm523_vm0 = vmmov 0   ;;  %v192_v1 = vld [vmem:[%s659_s2] sm:$0xff]  ;;  %s185_s28 = scalar_select %p184_p11, %s512_s15, 1  ;;  %v524_v2 = vmov 0   ;;  %vm203_vm1 = vcmask 1043456  }
  0x15   : > { %380 = vmatprep.subr.mxu0 %v522_v0  ;;  %382 = vmatprep.mubr.msk.f32.mxu0 %vm523_vm0, %v522_v0  ;;  %v191_v3 = vld [vmem:[%s658_s1] sm:$0xff]  ;;  %vm199_vm2 = vcmask 31744   ;;  %vm277_vm3 = vcmask 130048   ;;  %p446_p13 = pnand %p445_p12, %p586_p4  ;;  %s525_s15 = smov [#allocation2]  }
  0x16   : > { %443 = vset.pattern.permute.xlu0 %v524_v2  ;;  %s371_s29 = sshll.u32 %s185_s28, 2  ;;  %s448_s28 = sshll.u32 %s525_s15, 4  ;;  %s449_s28 = int_to_ptr.vmem [resolvable:$false] %s448_s28 }
  0x17   : > { %196 = vperm.xlu0 %443, %v192_v1   ;;  %s190_s5 = scalar_lea.vmem %s657_s0, %s371_s29  ;;  %p447_p0 = pneg %p446_p13 }
  0x18   : > { %v193_v4 = vld [vmem:[%s190_s5] sm:$0xf]  ;;  %s450_s29 = scalar_lea.vmem %s449_s28, 256  ;;  %p451_p1 = scmp.lt.s32.totalorder %s295_s18, %s449_s28 }
  0x19   : > { %381 = vmatpush3.msk.msra.mxu0 %vm203_vm1, %v193_v4  ;;  %p452_p2 = scmp.lt.s32.totalorder %s450_s29, %s444_s27 }
  0x1a   : > { %383 = vmatmul.mubr.msk.f32.vlgmr.msra.gmra.mxu0 %vm199_vm2, %v191_v3 }
  0x1b   : > { %p453_p3 = por %p452_p2, %p451_p1 }
  0x1d   : > { %p454_p5 = pnand %p453_p3, %p447_p0 }
  0x92   : > { %v197_v5 = vpop.permute.xlu0 %196 }
  0xda   : > { %v273_v6 = vpop.f32.mrf.mxu0 }
  0xdb   : > { %v274_v7 = vadd.f32 %v273_v6, %v197_v5 }
  0xdc   : > { %v384_v8 = vpop.f32.mrf.mxu0 }
  0xdd   : > { %278 = vst.msk [vmem:[%s183_s11] sm:$0xff] %vm277_vm3, %v274_v7 }
  0xde   : > { %457 = shalt.err (!%p454_p5)
}
  0xdf   : > { %s458_s30 = scalar_lea.hbm %s617_s23, 128  ;;  %s462_s6 = scalar_lea.hbm %s660_s3, 256 }
  0xe0   : > { %p459_p6 = scmp.ne.s32.totalorder %s617_s23, %s458_s30  ;;  %p463_p10 = scmp.lt.s32.totalorder %s617_s23, %s660_s3 }
  0xe1   : > { %p464_p11 = scmp.lt.s32.totalorder %s462_s6, %s458_s30 }
  0xe2   : > { %p460_p7 = pnand %p459_p6, %p586_p4 }
  0xe3   : > { %p465_p12 = por %p464_p11, %p463_p10 }
  0xe4   : > { %p461_p9 = pneg %p460_p7 }
  0xe6   : > { %p466_p13 = pnand %p465_p12, %p461_p9 }
  0xe8   : > { %469 = shalt.err (!%p466_p13)
}
  0xe9   : > { %385 = dma.vmem_to_hbm [thread:$0]  (%p586_p4), %s295_s18, 128, %s617_s23, %s280_s26  }
  0xea PF: > { %p391_p0 = scmp.ge.s32.totalorder %s520_s17, 2  ;;  %s306_s9 = sand.u32 1, %s500_s12  }
  0xeb   : > { %s307_s10 = scalar_lea.sflag [#allocation3], %s306_s9 }
  0xec   : > { %p388_p1 = pnand %p391_p0, %p593_p8 }
  0xee   : > { %p389_p2 = pneg %p388_p1 }
  0xf0   : > { %495 = dma.done.wait (%p389_p2), %s307_s10, 128  }
  0xf1   : > { %497 = vsyncadd (%p389_p2), %s307_s10, 4294967168  ;;  %s16_s17 = sadd.s32 1, %s520_s17   ;;  %s663_s12 = smov %s504_s13 }
  0xf2   : > { %p13_p3 = scmp.ge.s32.totalorder %s16_s17, 4   ;;  %s664_s13 = smov %s508_s14 }
  0xf3   : > { %s665_s14 = smov %s599_s25  ;;  %s666_s15 = smov %s516_s16 }
  0xf4   : > { %s667_s16 = smov %s669_s20  ;;  %15 = sbr.rel (!%p13_p3) target bundleno = 4 (0x4), region = 67 }
  0xf9   :  { %312 = vsyncpa [#allocation3], 1 }
  0xfa   :  { %314 = vsyncpa [#allocation3 + $0x1], 1 }

</bundles_post_ra>
